<compile_context>
chip_gen: v6e
topology: v6e:2x2x1
jax: 0.10.0
libtpu: 0.0.40
codegen_flags: <defaults>
</compile_context>

<pallas_src>
import math

import jax
import jax.numpy as jnp
from jax.experimental import pallas as pl
from jax.experimental.pallas import tpu as pltpu


def _round_up(a, b):
    return (a + b - 1) // b * b


# ---------------------------------------------------------------------------
# Pallas kernel: fused  relu(x @ Wd + bd) @ Wu + bu + x   (on packed layout)
# ---------------------------------------------------------------------------
def _adapter_kernel(x_ref, wd_ref, bd_ref, wu_ref, bu_ref, o_ref):
    x = x_ref[...]                                   # (tm_rows, Dp), input dtype

    # down projection + bias + relu (f32 accumulation on the MXU)
    z = jnp.dot(x, wd_ref[...], preferred_element_type=jnp.float32)
    z = jnp.maximum(z + bd_ref[...], 0.0)

    # dropout: identity (eval mode)
    # TODO(synk): training-mode dropout not implemented.

    # up projection + bias
    y = jnp.dot(z.astype(wu_ref.dtype), wu_ref[...],
                preferred_element_type=jnp.float32)
    y = y + bu_ref[...]

    # residual (promotes to f32 if x is lower precision), cast back on store
    o_ref[...] = (y + x).astype(o_ref.dtype)


def phm_adapter_forward(x, w_down, b_down, w_up, b_up, *, pack=None, tm=1024,
                        act_vmem_budget=24 << 20, vmem_limit_bytes=48 << 20):
    """x: [B, S, D] -> [B, S, D] (eval-mode PHMAdapterExpert forward)."""
    B, S, D = x.shape
    d = w_down.shape[1]
    M = B * S
    itemsize = jnp.dtype(x.dtype).itemsize

    # ---- lane-dense packing -------------------------------------------------
    # Pack `pack` tokens per packed row so the last dim is a multiple of 128
    # (unmasked, full-lane vst).  pack=1 when D is already lane-aligned, or when
    # the block-diagonal kron(I_pack, W) weight blowup would be too large.
    if pack is None:
        if D % 128 == 0:
            pack = 1
        else:
            cand = 128 // math.gcd(D, 128)
            wbytes = cand * cand * D * d * itemsize
            pack = cand if (cand * D <= 1024 and wbytes <= (8 << 20)) else 1

    Dp, dp = pack * D, pack * d

    # block-diagonal packed weights (tiny, built once); stream in the input dtype
    wdt = x.dtype
    wd_p = jnp.kron(jnp.eye(pack, dtype=w_down.dtype), w_down).astype(wdt)   # (Dp, dp)
    wu_p = jnp.kron(jnp.eye(pack, dtype=w_up.dtype), w_up).astype(wdt)       # (dp, Dp)
    bd_p = jnp.tile(b_down.reshape(1, d), (1, pack)).astype(jnp.float32)     # (1, dp)
    bu_p = jnp.tile(b_up.reshape(1, D), (1, pack)).astype(jnp.float32)       # (1, Dp)

    # ---- token packing (pad only to a multiple of `pack`, usually a no-op) --
    x2 = x.reshape(M, D)
    M_pack = _round_up(M, pack)
    if M_pack != M:
        x2 = jnp.pad(x2, ((0, M_pack - M), (0, 0)))   # < pack rows of padding
    rows = M_pack // pack
    xp = x2.reshape(rows, Dp)                          # free row-major reshape

    # ---- tile selection ------------------------------------------------------
    min_rows = max(8, 32 // itemsize)                  # 8 f32 / 16 bf16 / 32 int8
    cap = act_vmem_budget // (4 * Dp * itemsize)       # 2 arrays x 2 buffers
    cap = max(min_rows, (min(tm, cap) // min_rows) * min_rows)
    if rows <= min_rows:
        tm_rows = rows                                 # single full-extent block
    else:
        steps = max(2, pl.cdiv(rows, cap))             # >=2 steps: v7x megacore
        tm_rows = min(cap, _round_up(pl.cdiv(rows, steps), min_rows))
    grid = (pl.cdiv(rows, tm_rows),)                   # partial last block is masked

    # ---- cost estimate (advisory) -------------------------------------------
    flops = 4 * rows * Dp * dp                         # both matmuls, packed widths
    bytes_accessed = (2 * xp.size * itemsize
                      + (wd_p.size + wu_p.size) * jnp.dtype(wdt).itemsize
                      + (bd_p.size + bu_p.size) * 4)

    out = pl.pallas_call(
        _adapter_kernel,
        out_shape=jax.ShapeDtypeStruct((rows, Dp), x.dtype),
        grid_spec=pltpu.PrefetchScalarGridSpec(
            num_scalar_prefetch=0,
            grid=grid,
            in_specs=[
                pl.BlockSpec((tm_rows, Dp), lambda i: (i, 0)),   # packed x rows
                pl.BlockSpec((Dp, dp), lambda i: (0, 0)),        # blockdiag W_down
                pl.BlockSpec((1, dp), lambda i: (0, 0)),         # tiled b_down
                pl.BlockSpec((dp, Dp), lambda i: (0, 0)),        # blockdiag W_up
                pl.BlockSpec((1, Dp), lambda i: (0, 0)),         # tiled b_up
            ],
            out_specs=pl.BlockSpec((tm_rows, Dp), lambda i: (i, 0)),
        ),
        compiler_params=pltpu.CompilerParams(
            dimension_semantics=("parallel",),
            vmem_limit_bytes=int(vmem_limit_bytes),
        ),
        cost_estimate=pl.CostEstimate(
            flops=int(flops), transcendentals=0,
            bytes_accessed=int(bytes_accessed)),
    )(xp, wd_p, bd_p, wu_p, bu_p)

    out = out.reshape(M_pack, D)
    if M_pack != M:
        out = out[:M]
    return out.reshape(B, S, D)


# ---------------------------------------------------------------------------
# Parameter construction (glue): PHM Kronecker-sum weights
# ---------------------------------------------------------------------------
def kron_sum(phm_rule, W):
    """H = sum_b kron(phm_rule[b], W[b]).

    phm_rule: (phm_dim, phm_dim, phm_dim)
    W:        (phm_dim, in/phm_dim, out/phm_dim)
    returns:  (in, out)
    """
    pd, m, n = phm_rule.shape
    _, p, q = W.shape
    H = jnp.einsum("bij,bkl->ikjl", phm_rule, W)   # sum over b, kron layout
    return H.reshape(m * p, n * q)


def init_phm_linear(key, in_features, out_features, phm_dim, phm_init_range=0.0001):
    """Deterministic init of a (non-factorized, non-shared) PHMLinear."""
    k1, k2 = jax.random.split(key)
    # phm_rule ~ N(0, phm_init_range)  (config.phm_c_init == "normal")
    phm_rule = phm_init_range * jax.random.normal(
        k1, (phm_dim, phm_dim, phm_dim), dtype=jnp.float32
    )
    # W ~ glorot-ish normal  (config.hypercomplex_nonlinearity = "glorot-normal")
    fan_in, fan_out = in_features // phm_dim, out_features // phm_dim
    std = (2.0 / (fan_in + fan_out)) ** 0.5
    W = std * jax.random.normal(k2, (phm_dim, fan_in, fan_out), dtype=jnp.float32)
    b = jnp.zeros((out_features,), dtype=jnp.float32)
    H = kron_sum(phm_rule, W)                       # (in_features, out_features)
    return H, b


def reference_forward(x, w_down, b_down, w_up, b_up):
    """Pure-JAX reference matching PHMAdapterExpert.forward (eval mode)."""
    z = jnp.einsum("bsd,dh->bsh", x, w_down) + b_down
    z = jnp.maximum(z, 0.0)
    z = jnp.einsum("bsh,hd->bsd", z, w_up) + b_up
    return z + x


# ---------------------------------------------------------------------------
# Main
# ---------------------------------------------------------------------------
if __name__ == "__main__":
    # config: input_dim=32, reduction_factor=4, hypercomplex_division=4,
    #         non_linearity="relu", phm_c_init="normal", phm_init_range=1e-4,
    #         factorized_phm=False, shared_phm_rule=False, shared_W_phm=False
    input_dim = 32
    reduction_factor = 4
    phm_dim = 4
    down_sample_size = input_dim // reduction_factor   # 8

    batch, seq = 2, 8

    key = jax.random.PRNGKey(0)
    kx, kd, ku = jax.random.split(key, 3)

    x = jax.random.normal(kx, (batch, seq, input_dim), dtype=jnp.float32)

    # down_sampler: PHMLinear(32 -> 8), up_sampler: PHMLinear(8 -> 32)
    w_down, b_down = init_phm_linear(kd, input_dim, down_sample_size, phm_dim)
    # bump phm_rule scale a little for the up path so values are non-trivial
    w_up, b_up = init_phm_linear(ku, down_sample_size, input_dim, phm_dim,
                                 phm_init_range=0.1)

    out = phm_adapter_forward(x, w_down, b_down, w_up, b_up)
    out = jax.block_until_ready(out)

    ref = reference_forward(x, w_down, b_down, w_up, b_up)
    assert out.shape == x.shape
    assert jnp.allclose(out, ref, atol=1e-5, rtol=1e-5)

    print("KERNEL_OK")
</pallas_src>

<mosaic_0001>
module attributes {stable_mosaic.version = 11 : i64} {
  func.func @_adapter_kernel(%arg0: i32, %arg1: memref<4x128xf32, #tpu.memory_space<vmem>>, %arg2: memref<128x32xf32, #tpu.memory_space<vmem>>, %arg3: memref<1x32xf32, #tpu.memory_space<vmem>>, %arg4: memref<32x128xf32, #tpu.memory_space<vmem>>, %arg5: memref<1x128xf32, #tpu.memory_space<vmem>>, %arg6: memref<4x128xf32, #tpu.memory_space<vmem>>) attributes {dimension_semantics = [#tpu.dimension_semantics<parallel>], iteration_bounds = array<i64: 1>, scalar_prefetch = 0 : i64, scratch_operands = 0 : i64, tpu.core_type = #tpu.core_type<tc>, window_params = [{transform_indices = @transform_0, window_bounds = array<i64: 4, 128>}, {pipeline_mode = #tpu.pipeline_mode<synchronous>, transform_indices = @transform_1, window_bounds = array<i64: 128, 32>}, {pipeline_mode = #tpu.pipeline_mode<synchronous>, transform_indices = @transform_2, window_bounds = array<i64: 1, 32>}, {pipeline_mode = #tpu.pipeline_mode<synchronous>, transform_indices = @transform_3, window_bounds = array<i64: 32, 128>}, {pipeline_mode = #tpu.pipeline_mode<synchronous>, transform_indices = @transform_4, window_bounds = array<i64: 1, 128>}, {transform_indices = @transform_5, window_bounds = array<i64: 4, 128>}]} {
    %c0 = arith.constant 0 : index
    %c0_0 = arith.constant 0 : index
    %0 = vector.load %arg1[%c0, %c0_0] : memref<4x128xf32, #tpu.memory_space<vmem>>, vector<4x128xf32>
    %c0_1 = arith.constant 0 : index
    %c0_2 = arith.constant 0 : index
    %1 = vector.load %arg2[%c0_1, %c0_2] : memref<128x32xf32, #tpu.memory_space<vmem>>, vector<128x32xf32>
    %cst = arith.constant dense<0.000000e+00> : vector<4x32xf32>
    %2 = tpu.matmul %0, %1, %cst {dimension_numbers = #tpu.dot_dimension_numbers<[1], [0], [0], [1], [0, 0, 1, 1], [], []>} : vector<4x128xf32>, vector<128x32xf32>, vector<4x32xf32> -> vector<4x32xf32>
    %c0_3 = arith.constant 0 : index
    %c0_4 = arith.constant 0 : index
    %3 = vector.load %arg3[%c0_3, %c0_4] : memref<1x32xf32, #tpu.memory_space<vmem>>, vector<1x32xf32>
    %4 = vector.broadcast %3 : vector<1x32xf32> to vector<4x32xf32>
    %5 = arith.addf %2, %4 : vector<4x32xf32>
    %cst_5 = arith.constant 0.000000e+00 : f32
    %6 = vector.broadcast %cst_5 : f32 to vector<4x32xf32>
    %7 = arith.maximumf %5, %6 : vector<4x32xf32>
    %c0_6 = arith.constant 0 : index
    %c0_7 = arith.constant 0 : index
    %8 = vector.load %arg4[%c0_6, %c0_7] : memref<32x128xf32, #tpu.memory_space<vmem>>, vector<32x128xf32>
    %cst_8 = arith.constant dense<0.000000e+00> : vector<4x128xf32>
    %9 = tpu.matmul %7, %8, %cst_8 {dimension_numbers = #tpu.dot_dimension_numbers<[1], [0], [0], [1], [0, 0, 1, 1], [], []>} : vector<4x32xf32>, vector<32x128xf32>, vector<4x128xf32> -> vector<4x128xf32>
    %c0_9 = arith.constant 0 : index
    %c0_10 = arith.constant 0 : index
    %10 = vector.load %arg5[%c0_9, %c0_10] : memref<1x128xf32, #tpu.memory_space<vmem>>, vector<1x128xf32>
    %11 = vector.broadcast %10 : vector<1x128xf32> to vector<4x128xf32>
    %12 = arith.addf %9, %11 : vector<4x128xf32>
    %13 = arith.addf %12, %0 : vector<4x128xf32>
    %c0_11 = arith.constant 0 : index
    %c0_12 = arith.constant 0 : index
    %14 = vector.load %arg6[%c0_11, %c0_12] : memref<4x128xf32, #tpu.memory_space<vmem>>, vector<4x128xf32>
    tpu.vector_store %arg6[%c0_11, %c0_12], %13 {strides = array<i32>} : memref<4x128xf32, #tpu.memory_space<vmem>>, vector<4x128xf32>,
    return
  }
  func.func @transform_0(%arg0: i32) -> (i32, i32) {
    %c0_i32 = arith.constant 0 : i32
    %c0_i32_0 = arith.constant 0 : i32
    return %arg0, %c0_i32 : i32, i32
  }
  func.func @transform_1(%arg0: i32) -> (i32, i32) {
    %c0_i32 = arith.constant 0 : i32
    %c0_i32_0 = arith.constant 0 : i32
    %c0_i32_1 = arith.constant 0 : i32
    return %c0_i32, %c0_i32_0 : i32, i32
  }
  func.func @transform_2(%arg0: i32) -> (i32, i32) {
    %c0_i32 = arith.constant 0 : i32
    %c0_i32_0 = arith.constant 0 : i32
    %c0_i32_1 = arith.constant 0 : i32
    return %c0_i32, %c0_i32_0 : i32, i32
  }
  func.func @transform_3(%arg0: i32) -> (i32, i32) {
    %c0_i32 = arith.constant 0 : i32
    %c0_i32_0 = arith.constant 0 : i32
    %c0_i32_1 = arith.constant 0 : i32
    return %c0_i32, %c0_i32_0 : i32, i32
  }
  func.func @transform_4(%arg0: i32) -> (i32, i32) {
    %c0_i32 = arith.constant 0 : i32
    %c0_i32_0 = arith.constant 0 : i32
    %c0_i32_1 = arith.constant 0 : i32
    return %c0_i32, %c0_i32_0 : i32, i32
  }
  func.func @transform_5(%arg0: i32) -> (i32, i32) {
    %c0_i32 = arith.constant 0 : i32
    %c0_i32_0 = arith.constant 0 : i32
    return %arg0, %c0_i32 : i32, i32
  }
}

</mosaic_0001>

<bundles_post_ra>
// kernel: tpu_custom_call.1
= control target key start
LH: loop header
LB: loop body
LE: loop exit
PB: predicated region body
PF: predicated region fallthrough
CT: control target
= control target key end

     0   :  { %v313_v1 = vmov 0.0   ;;  %vm314_vm0 = vmmov 0   ;;  %s418_s0 = inlined_call_operand.vmem [shape: f32[4,128], index: 0, kind: input, shape index: {}]   ;;  %s419_s1 = inlined_call_operand.vmem [shape: f32[128,32], index: 1, kind: input, shape index: {}]   ;;  %s420_s2 = inlined_call_operand.vmem [shape: f32[1,32], index: 2, kind: input, shape index: {}]   ;;  %s421_s3 = inlined_call_operand.vmem [shape: f32[32,128], index: 3, kind: input, shape index: {}]   ;;  %s422_s4 = inlined_call_operand.vmem [shape: f32[1,128], index: 4, kind: input, shape index: {}]   ;;  %s423_s5 = inlined_call_operand.hbm [shape: f32[4,128], index: 5, kind: output, shape index: {}]  }
   0x1   :  { %v37_v0 = vld [vmem:[%s419_s1 + $0x78] sm:$0xff]  ;;  %242 = vmatprep.subr.mxu0 %v313_v1  ;;  %v36_v2 = vld [vmem:[%s419_s1 + $0x70] sm:$0xff]  ;;  %274 = vmatprep.mubr.msk.f32.mxu0 %vm314_vm0, %v313_v1  ;;  %v35_v3 = vld [vmem:[%s419_s1 + $0x68] sm:$0xff] }
   0x2   :  { %243 = vmatpush3.msra.mxu0 %v37_v0  ;;  %277 = vmatprep.subr.mxu1 %v313_v1  ;;  %v34_v4 = vld [vmem:[%s419_s1 + $0x60] sm:$0xff]  ;;  %v119_v5 = vld [vmem:[%s421_s3 + $0x18] sm:$0xff] }
   0x3   :  { %244 = vmatprep.subr.mxu0 %v313_v1  ;;  %285 = vmatprep.mubr.msk.f32.mxu1 %vm314_vm0, %v313_v1 }
   0x4   :  { %245 = vmatpush3.msra.mxu0 %v36_v2  ;;  %278 = vmatpush3.msra.mxu1 %v119_v5 }
   0x5   :  { %246 = vmatprep.subr.mxu0 %v313_v1 }
   0x6   :  { %247 = vmatpush3.msra.mxu0 %v35_v3 }
   0x7   :  { %10 = vsyncpa [#allocation3], 0  ;;  %248 = vmatprep.subr.mxu0 %v313_v1  ;;  %v33_v6 = vld [vmem:[%s419_s1 + $0x58] sm:$0xff]  ;;  %279 = vmatprep.subr.mxu1 %v313_v1  ;;  %v32_v7 = vld [vmem:[%s419_s1 + $0x50] sm:$0xff]  ;;  %vm127_vm1 = vcmask 261120   ;;  %s315_s12 = smov [#allocation2]  }
   0x8   :  { %249 = vmatpush3.msra.mxu0 %v34_v4  ;;  %v31_v8 = vld [vmem:[%s419_s1 + $0x48] sm:$0xff]  ;;  %v30_v9 = vld [vmem:[%s419_s1 + $0x40] sm:$0xff]  ;;  %v29_v10 = vld [vmem:[%s419_s1 + $0x38] sm:$0xff]  ;;  %s209_s13 = sshll.u32 %s315_s12, 4  ;;  %s210_s13 = int_to_ptr.vmem [resolvable:$true] %s209_s13 }
   0x9   :  { %250 = vmatprep.subr.mxu0 %v313_v1  ;;  %v28_v11 = vld [vmem:[%s419_s1 + $0x30] sm:$0xff]  ;;  %v27_v12 = vld [vmem:[%s419_s1 + $0x28] sm:$0xff]  ;;  %v26_v13 = vld [vmem:[%s419_s1 + $0x20] sm:$0xff]  ;;  %p296_p1 = scmp.lt.s32.totalorder %s210_s13, %s210_s13 }
   0xa   :  { %251 = vmatpush3.msra.mxu0 %v33_v6  ;;  %v25_v14 = vld [vmem:[%s419_s1 + $0x18] sm:$0xff]  ;;  %v24_v15 = vld [vmem:[%s419_s1 + $0x10] sm:$0xff]  ;;  %v23_v16 = vld [vmem:[%s419_s1 + $0x8] sm:$0xff] }
   0xb   :  { %252 = vmatprep.subr.mxu0 %v313_v1  ;;  %v22_v17 = vld [vmem:[%s419_s1] sm:$0xff]  ;;  %v118_v19 = vld [vmem:[%s421_s3 + $0x10] sm:$0xff]  ;;  %v117_v20 = vld [vmem:[%s421_s3 + $0x8] sm:$0xff] }
   0xc   :  { %253 = vmatpush3.msra.mxu0 %v32_v7  ;;  %v21_v18 = vld [vmem:[%s418_s0] sm:$0xf]  ;;  %280 = vmatpush3.msra.mxu1 %v118_v19 }
   0xd   :  { %254 = vmatprep.subr.mxu0 %v313_v1  ;;  %281 = vmatprep.subr.mxu1 %v313_v1  ;;  %v116_v21 = vld [vmem:[%s421_s3] sm:$0xff]  ;;  %s291_s3 = scalar_lea.vmem %s210_s13, 64 }
   0xe   :  { %255 = vmatpush3.msra.mxu0 %v31_v8  ;;  %282 = vmatpush3.msra.mxu1 %v117_v20  ;;  %v217_v22 = vld [vmem:[%s420_s2] ss:$0 sm:$0xff]  ;;  %p292_p0 = scmp.ne.s32.totalorder %s210_s13, %s291_s3  ;;  %p297_p2 = scmp.lt.s32.totalorder %s291_s3, %s291_s3 }
   0xf   :  { %256 = vmatprep.subr.mxu0 %v313_v1  ;;  %283 = vmatprep.subr.mxu1 %v313_v1  ;;  %v218_v27 = vld [vmem:[%s422_s4] ss:$0 sm:$0xff] }
  0x10   :  { %257 = vmatpush3.msra.mxu0 %v30_v9  ;;  %284 = vmatpush3.msra.mxu1 %v116_v21  ;;  %p298_p3 = por %p297_p2, %p296_p1 }
  0x11   :  { %258 = vmatprep.subr.mxu0 %v313_v1 }
  0x12   :  { %259 = vmatpush3.msra.mxu0 %v29_v10  ;;  %p299_p4 = pnand %p298_p3, %p292_p0 }
  0x13   :  { %260 = vmatprep.subr.mxu0 %v313_v1 }
  0x14   :  { %261 = vmatpush3.msra.mxu0 %v28_v11 }
  0x15   :  { %262 = vmatprep.subr.mxu0 %v313_v1 }
  0x16   :  { %263 = vmatpush3.msra.mxu0 %v27_v12 }
  0x17   :  { %264 = vmatprep.subr.mxu0 %v313_v1 }
  0x18   :  { %265 = vmatpush3.msra.mxu0 %v26_v13 }
  0x19   :  { %266 = vmatprep.subr.mxu0 %v313_v1 }
  0x1a   :  { %267 = vmatpush3.msra.mxu0 %v25_v14 }
  0x1b   :  { %268 = vmatprep.subr.mxu0 %v313_v1 }
  0x1c   :  { %269 = vmatpush3.msra.mxu0 %v24_v15 }
  0x1d   :  { %270 = vmatprep.subr.mxu0 %v313_v1 }
  0x1e   :  { %271 = vmatpush3.msra.mxu0 %v23_v16 }
  0x1f   :  { %272 = vmatprep.subr.mxu0 %v313_v1 }
  0x20   :  { %273 = vmatpush3.msra.mxu0 %v22_v17 }
  0x21   :  { %275 = vmatmul.mubr.f32.vlgmr.msra.gmra.mxu0 %v21_v18 }
  0xe1   :  { %v111_v23 = vpop.f32.mrf.mxu0 }
  0xe2   :  { %v112_v24 = vadd.f32 %v217_v22, %v111_v23 }
  0xe3   :  { %v276_v25 = vpop.f32.mrf.mxu0 }
  0xe4   :  { %v115_v26 = vmax.f32 %v112_v24, 0.0 }
  0xe6   :  { %286 = vmatmul.mubr.msk.f32.vlgmr.msra.gmra.mxu1 %vm127_vm1, %v115_v26 }
 0x1a6   :  { %v197_v28 = vpop.f32.mrf.mxu1 }
 0x1a7   :  { %v198_v29 = vadd.f32 %v218_v27, %v197_v28 }
 0x1a8   :  { %v287_v30 = vpop.f32.mrf.mxu1 }
 0x1a9   :  { %v201_v31 = vadd.f32 %v198_v29, %v21_v18 }
 0x1ab   :  { %202 = vst [vmem:[#allocation2] sm:$0xf] %v201_v31 }
 0x1ac   :  { %302 = shalt.err (!%p299_p4)
}
 0x1ad   :  { %212 = dma.vmem_to_hbm [thread:$0]  %s210_s13, 64, %s423_s5, [#allocation3]  }
 0x1ae   :  { %311 = dma.done.wait [#allocation3], 64  }
 0x1af   :  { %312 = vsyncadd [#allocation3], 4294967232 }
 0x1b0   :  { %216 = vsyncpa [#allocation3], 1 }

</bundles_post_ra>
